<compile_context>
chip_gen: v6e
topology: v6e:2x2x1
jax: 0.10.0
libtpu: 0.0.40
codegen_flags: <defaults>
</compile_context>

<pallas_src>
import functools
import math

import jax
import jax.numpy as jnp
from jax.experimental import pallas as pl
from jax.experimental.pallas import tpu as pltpu

LANES = 128
SUBLANES = 8
ROW_ALIGN = 16          # multiple of bf16 sublane tile (16) and f32 tile (8)
MAX_BLOCK_ROWS = 4096   # (4096, 128) f32 = 2 MiB per input per pipeline buffer


def _round_up(x, m):
    return -(-x // m) * m


def _bce_dice_partials_kernel(p_ref, t_ref, pt_ref, u_ref, bce_ref, *,
                              block_rows, valid_rows_last, has_partial_block):
    """Accumulates per-split (8,128) partial sums of p*t, p+t, max(p,0)+log1p(exp(-|p|))."""
    inner = pl.program_id(1)

    @pl.when(inner == 0)
    def _init():
        pt_ref[...] = jnp.zeros_like(pt_ref)
        u_ref[...] = jnp.zeros_like(u_ref)
        bce_ref[...] = jnp.zeros_like(bce_ref)

    def fold(x):
        # (block_rows, 128) -> (8, 128): reduction over the leading axis is plain VPU adds
        # (the trailing (8,128) vreg tile layout is unchanged by this reshape).
        return jnp.sum(x.reshape(block_rows // SUBLANES, SUBLANES, LANES), axis=0)

    def accumulate(p, t):
        # p*t is computed once and reused: it feeds the dice intersection here and the
        # "- p*t" BCEWithLogits term via the wrapper (sum(bce) = sum(core) - sum(p*t)).
        pt_ref[...] += fold(p * t)
        u_ref[...] += fold(p + t)
        # Numerically-stable "core" of BCEWithLogits: max(p,0) + log1p(exp(-|p|)).
        bce_ref[...] += fold(jnp.maximum(p, 0.0) + jnp.log1p(jnp.exp(-jnp.abs(p))))

    p_raw = p_ref[...].astype(jnp.float32)
    t_raw = t_ref[...].astype(jnp.float32)

    if has_partial_block:
        is_last = jnp.logical_and(pl.program_id(0) == pl.num_programs(0) - 1,
                                  inner == pl.num_programs(1) - 1)

        @pl.when(jnp.logical_not(is_last))
        def _full_block():
            accumulate(p_raw, t_raw)

        @pl.when(is_last)
        def _partial_block():
            # Rows >= valid_rows_last were never DMA'd (garbage, possibly NaN): zero them
            # with a select so nothing propagates.  Zeroed elements contribute exactly
            # ln(2) to the bce partial; the wrapper subtracts that analytically.
            row_id = jax.lax.broadcasted_iota(jnp.int32, (block_rows, LANES), 0)
            keep = row_id < valid_rows_last
            accumulate(jnp.where(keep, p_raw, 0.0), jnp.where(keep, t_raw, 0.0))
    else:
        accumulate(p_raw, t_raw)


def bce_dice_loss_pallas(preds, targets, *, max_block_rows=MAX_BLOCK_ROWS):
    """Pallas implementation of BceDiceLoss()(preds, targets). Returns an f32 scalar."""
    assert preds.shape == targets.shape, (preds.shape, targets.shape)
    assert max_block_rows % ROW_ALIGN == 0
    total = int(math.prod(preds.shape))
    assert total > 0

    # Lane-dense (rows, 128) slab in each input's *native* dtype (no f32 upcast in HBM).
    # Only a tiny tail pad (< ROW_ALIGN*LANES elems) when the element count is misaligned.
    rows = -(-total // LANES)
    padded_rows = _round_up(rows, ROW_ALIGN)
    padded_total = padded_rows * LANES
    flat_p = preds.reshape(-1)
    flat_t = targets.reshape(-1)
    if padded_total != total:
        flat_p = jnp.pad(flat_p, (0, padded_total - total))
        flat_t = jnp.pad(flat_t, (0, padded_total - total))
    p2 = flat_p.reshape(padded_rows, LANES)
    t2 = flat_t.reshape(padded_rows, LANES)

    block_rows = min(max_block_rows, padded_rows)
    total_blocks = -(-padded_rows // block_rows)
    # v7x has 2 TensorCores: if the block count is odd, rebalance the block size so the
    # count becomes even and both cores get identical work (harmless on 1-TC chips).
    if total_blocks > 1 and total_blocks % 2 == 1:
        block_rows = _round_up(-(-padded_rows // (total_blocks + 1)), ROW_ALIGN)
        total_blocks = -(-padded_rows // block_rows)
    num_splits = 2 if total_blocks % 2 == 0 else 1
    inner_blocks = total_blocks // num_splits

    valid_rows_last = padded_rows - (total_blocks - 1) * block_rows
    has_partial_block = valid_rows_last != block_rows
    # Every element beyond `total` that the kernel folds in (explicit zero pad + masked
    # garbage rows, all forced to p=t=0) contributes exactly log(2) to the bce partial.
    n_zero = total_blocks * block_rows * LANES - total

    kernel = functools.partial(
        _bce_dice_partials_kernel,
        block_rows=block_rows,
        valid_rows_last=valid_rows_last,
        has_partial_block=has_partial_block,
    )

    in_spec = pl.BlockSpec((block_rows, LANES),
                           lambda s, i: (s * inner_blocks + i, 0))
    out_spec = pl.BlockSpec((None, SUBLANES, LANES), lambda s, i: (s, 0, 0))
    part_shape = jax.ShapeDtypeStruct((num_splits, SUBLANES, LANES), jnp.float32)

    bytes_in = total * (preds.dtype.itemsize + targets.dtype.itemsize)
    cost = pl.CostEstimate(
        flops=9 * total,
        transcendentals=2 * total,
        bytes_accessed=bytes_in + 3 * num_splits * SUBLANES * LANES * 4,
    )

    pt_part, u_part, bce_part = pl.pallas_call(
        kernel,
        out_shape=(part_shape, part_shape, part_shape),
        grid=(num_splits, inner_blocks),
        in_specs=[in_spec, in_spec],
        out_specs=(out_spec, out_spec, out_spec),
        compiler_params=pltpu.CompilerParams(
            dimension_semantics=("parallel", "arbitrary"),
            vmem_limit_bytes=48 * 1024 * 1024,
        ),
        cost_estimate=cost,
    )(p2, t2)

    # Tiny finalize in plain JAX (also merges the per-TensorCore partials).
    smooth = jnp.float32(1.0)
    s_pt = jnp.sum(pt_part)
    s_u = jnp.sum(u_part)
    s_bce = jnp.sum(bce_part) - s_pt - jnp.float32(n_zero * math.log(2.0))
    bce_loss = s_bce / jnp.float32(total)
    dice_loss = 1.0 - (2.0 * s_pt + smooth) / (s_u + smooth)
    return bce_loss + dice_loss


def _reference_bce_dice_loss(preds, targets):
    """Pure-JAX reference matching the PyTorch semantics (for verification)."""
    p = preds.astype(jnp.float32)
    t = targets.astype(jnp.float32)
    smooth = 1.0
    intersection = 2.0 * jnp.sum(p * t) + smooth
    union = jnp.sum(p) + jnp.sum(t) + smooth
    dice_loss = 1.0 - intersection / union
    bce = jnp.maximum(p, 0.0) - p * t + jnp.log1p(jnp.exp(-jnp.abs(p)))
    return jnp.mean(bce) + dice_loss


if __name__ == "__main__":
    root = jax.random.PRNGKey(0)

    # (name, shape, preds dtype, targets dtype, max_block_rows override)
    cases = [
        # canonical small NCHW logits + binary masks; single block, no pad, no mask
        ("baseline", (2, 4, 16, 16), jnp.float32, jnp.float32, MAX_BLOCK_ROWS),
        # misaligned size: exercises tail zero-pad correction + partial last block mask
        ("pad_and_partial_block", (3, 2, 37, 41), jnp.float32, jnp.float32, 32),
        # multi-block, even block count: exercises the dual-split "parallel" axis + bf16 inputs
        ("dual_split_bf16", (1, 16, 32, 32), jnp.bfloat16, jnp.bfloat16, 32),
        # dual split AND partial last block AND mixed dtypes, all at once
        ("dual_split_partial_mixed", (2, 7, 1000), jnp.float32, jnp.bfloat16, 32),
    ]

    for idx, (name, shape, pdt, tdt, mbr) in enumerate(cases):
        kp, kt = jax.random.split(jax.random.fold_in(root, idx))
        preds = jax.random.normal(kp, shape, dtype=jnp.float32).astype(pdt)
        targets = (jax.random.uniform(kt, shape) > 0.5).astype(tdt)

        loss = jax.block_until_ready(bce_dice_loss_pallas(preds, targets, max_block_rows=mbr))
        ref = jax.block_until_ready(_reference_bce_dice_loss(preds, targets))
        assert jnp.allclose(loss, ref, rtol=1e-4, atol=1e-5), (name, loss, ref)

    print("KERNEL_OK")
</pallas_src>

<mosaic_0001>
module attributes {stable_mosaic.version = 11 : i64} {
  func.func @_bce_dice_partials_kernel(%arg0: i32, %arg1: i32, %arg2: memref<16x128xf32, #tpu.memory_space<vmem>>, %arg3: memref<16x128xf32, #tpu.memory_space<vmem>>, %arg4: memref<1x8x128xf32, #tpu.memory_space<vmem>>, %arg5: memref<1x8x128xf32, #tpu.memory_space<vmem>>, %arg6: memref<1x8x128xf32, #tpu.memory_space<vmem>>) attributes {dimension_semantics = [#tpu.dimension_semantics<parallel>, #tpu.dimension_semantics<arbitrary>], iteration_bounds = array<i64: 1, 1>, scalar_prefetch = 0 : i64, scratch_operands = 0 : i64, tpu.core_type = #tpu.core_type<tc>, window_params = [{transform_indices = @transform_0, window_bounds = array<i64: 16, 128>}, {transform_indices = @transform_1, window_bounds = array<i64: 16, 128>}, {transform_indices = @transform_2, window_bounds = array<i64: 1, 8, 128>}, {transform_indices = @transform_3, window_bounds = array<i64: 1, 8, 128>}, {transform_indices = @transform_4, window_bounds = array<i64: 1, 8, 128>}]} {
    %c0_i32 = arith.constant 0 : i32
    %0 = arith.cmpi eq, %arg1, %c0_i32 : i32
    %1 = arith.extui %0 : i1 to i32
    %c0_i32_0 = arith.constant 0 : i32
    %2 = arith.cmpi ne, %1, %c0_i32_0 : i32
    scf.if %2 {
      %cst_26 = arith.constant 0.000000e+00 : f32
      %39 = vector.broadcast %cst_26 : f32 to vector<8x128xf32>
      %c0_27 = arith.constant 0 : index
      %c0_28 = arith.constant 0 : index
      %c0_29 = arith.constant 0 : index
      %40 = vector.load %arg4[%c0_27, %c0_28, %c0_29] : memref<1x8x128xf32, #tpu.memory_space<vmem>>, vector<1x8x128xf32>
      %41 = vector.shape_cast %40 : vector<1x8x128xf32> to vector<8x128xf32>
      %42 = vector.shape_cast %39 : vector<8x128xf32> to vector<1x8x128xf32>
      tpu.vector_store %arg4[%c0_27, %c0_28, %c0_29], %42 {strides = array<i32>} : memref<1x8x128xf32, #tpu.memory_space<vmem>>, vector<1x8x128xf32>,
      %cst_30 = arith.constant 0.000000e+00 : f32
      %43 = vector.broadcast %cst_30 : f32 to vector<8x128xf32>
      %c0_31 = arith.constant 0 : index
      %c0_32 = arith.constant 0 : index
      %c0_33 = arith.constant 0 : index
      %44 = vector.load %arg5[%c0_31, %c0_32, %c0_33] : memref<1x8x128xf32, #tpu.memory_space<vmem>>, vector<1x8x128xf32>
      %45 = vector.shape_cast %44 : vector<1x8x128xf32> to vector<8x128xf32>
      %46 = vector.shape_cast %43 : vector<8x128xf32> to vector<1x8x128xf32>
      tpu.vector_store %arg5[%c0_31, %c0_32, %c0_33], %46 {strides = array<i32>} : memref<1x8x128xf32, #tpu.memory_space<vmem>>, vector<1x8x128xf32>,
      %cst_34 = arith.constant 0.000000e+00 : f32
      %47 = vector.broadcast %cst_34 : f32 to vector<8x128xf32>
      %c0_35 = arith.constant 0 : index
      %c0_36 = arith.constant 0 : index
      %c0_37 = arith.constant 0 : index
      %48 = vector.load %arg6[%c0_35, %c0_36, %c0_37] : memref<1x8x128xf32, #tpu.memory_space<vmem>>, vector<1x8x128xf32>
      %49 = vector.shape_cast %48 : vector<1x8x128xf32> to vector<8x128xf32>
      %50 = vector.shape_cast %47 : vector<8x128xf32> to vector<1x8x128xf32>
      tpu.vector_store %arg6[%c0_35, %c0_36, %c0_37], %50 {strides = array<i32>} : memref<1x8x128xf32, #tpu.memory_space<vmem>>, vector<1x8x128xf32>,
    } else {
    }
    %c0 = arith.constant 0 : index
    %c0_1 = arith.constant 0 : index
    %3 = vector.load %arg2[%c0, %c0_1] : memref<16x128xf32, #tpu.memory_space<vmem>>, vector<16x128xf32>
    %c0_2 = arith.constant 0 : index
    %c0_3 = arith.constant 0 : index
    %4 = vector.load %arg3[%c0_2, %c0_3] : memref<16x128xf32, #tpu.memory_space<vmem>>, vector<16x128xf32>
    %c0_4 = arith.constant 0 : index
    %c0_5 = arith.constant 0 : index
    %c0_6 = arith.constant 0 : index
    %5 = vector.load %arg4[%c0_4, %c0_5, %c0_6] : memref<1x8x128xf32, #tpu.memory_space<vmem>>, vector<1x8x128xf32>
    %6 = vector.shape_cast %5 : vector<1x8x128xf32> to vector<8x128xf32>
    %7 = arith.mulf %3, %4 : vector<16x128xf32>
    %8 = vector.shape_cast %7 : vector<16x128xf32> to vector<2x8x128xf32>
    %cst = arith.constant dense<0.000000e+00> : vector<8x128xf32>
    %9 = vector.multi_reduction <add>, %8, %cst [0] : vector<2x8x128xf32> to vector<8x128xf32>
    %10 = arith.addf %6, %9 : vector<8x128xf32>
    %c0_7 = arith.constant 0 : index
    %c0_8 = arith.constant 0 : index
    %c0_9 = arith.constant 0 : index
    %11 = vector.load %arg4[%c0_7, %c0_8, %c0_9] : memref<1x8x128xf32, #tpu.memory_space<vmem>>, vector<1x8x128xf32>
    %12 = vector.shape_cast %11 : vector<1x8x128xf32> to vector<8x128xf32>
    %13 = vector.shape_cast %10 : vector<8x128xf32> to vector<1x8x128xf32>
    tpu.vector_store %arg4[%c0_7, %c0_8, %c0_9], %13 {strides = array<i32>} : memref<1x8x128xf32, #tpu.memory_space<vmem>>, vector<1x8x128xf32>,
    %c0_10 = arith.constant 0 : index
    %c0_11 = arith.constant 0 : index
    %c0_12 = arith.constant 0 : index
    %14 = vector.load %arg5[%c0_10, %c0_11, %c0_12] : memref<1x8x128xf32, #tpu.memory_space<vmem>>, vector<1x8x128xf32>
    %15 = vector.shape_cast %14 : vector<1x8x128xf32> to vector<8x128xf32>
    %16 = arith.addf %3, %4 : vector<16x128xf32>
    %17 = vector.shape_cast %16 : vector<16x128xf32> to vector<2x8x128xf32>
    %cst_13 = arith.constant dense<0.000000e+00> : vector<8x128xf32>
    %18 = vector.multi_reduction <add>, %17, %cst_13 [0] : vector<2x8x128xf32> to vector<8x128xf32>
    %19 = arith.addf %15, %18 : vector<8x128xf32>
    %c0_14 = arith.constant 0 : index
    %c0_15 = arith.constant 0 : index
    %c0_16 = arith.constant 0 : index
    %20 = vector.load %arg5[%c0_14, %c0_15, %c0_16] : memref<1x8x128xf32, #tpu.memory_space<vmem>>, vector<1x8x128xf32>
    %21 = vector.shape_cast %20 : vector<1x8x128xf32> to vector<8x128xf32>
    %22 = vector.shape_cast %19 : vector<8x128xf32> to vector<1x8x128xf32>
    tpu.vector_store %arg5[%c0_14, %c0_15, %c0_16], %22 {strides = array<i32>} : memref<1x8x128xf32, #tpu.memory_space<vmem>>, vector<1x8x128xf32>,
    %c0_17 = arith.constant 0 : index
    %c0_18 = arith.constant 0 : index
    %c0_19 = arith.constant 0 : index
    %23 = vector.load %arg6[%c0_17, %c0_18, %c0_19] : memref<1x8x128xf32, #tpu.memory_space<vmem>>, vector<1x8x128xf32>
    %24 = vector.shape_cast %23 : vector<1x8x128xf32> to vector<8x128xf32>
    %cst_20 = arith.constant 0.000000e+00 : f32
    %25 = vector.broadcast %cst_20 : f32 to vector<16x128xf32>
    %26 = arith.maximumf %3, %25 : vector<16x128xf32>
    %27 = math.absf %3 : vector<16x128xf32>
    %cst_21 = arith.constant 0.000000e+00 : f32
    %28 = vector.broadcast %cst_21 : f32 to vector<16x128xf32>
    %29 = arith.subf %28, %27 : vector<16x128xf32>
    %30 = math.exp %29 : vector<16x128xf32>
    %31 = math.log1p %30 : vector<16x128xf32>
    %32 = arith.addf %26, %31 : vector<16x128xf32>
    %33 = vector.shape_cast %32 : vector<16x128xf32> to vector<2x8x128xf32>
    %cst_22 = arith.constant dense<0.000000e+00> : vector<8x128xf32>
    %34 = vector.multi_reduction <add>, %33, %cst_22 [0] : vector<2x8x128xf32> to vector<8x128xf32>
    %35 = arith.addf %24, %34 : vector<8x128xf32>
    %c0_23 = arith.constant 0 : index
    %c0_24 = arith.constant 0 : index
    %c0_25 = arith.constant 0 : index
    %36 = vector.load %arg6[%c0_23, %c0_24, %c0_25] : memref<1x8x128xf32, #tpu.memory_space<vmem>>, vector<1x8x128xf32>
    %37 = vector.shape_cast %36 : vector<1x8x128xf32> to vector<8x128xf32>
    %38 = vector.shape_cast %35 : vector<8x128xf32> to vector<1x8x128xf32>
    tpu.vector_store %arg6[%c0_23, %c0_24, %c0_25], %38 {strides = array<i32>} : memref<1x8x128xf32, #tpu.memory_space<vmem>>, vector<1x8x128xf32>,
    return
  }
  func.func @transform_0(%arg0: i32, %arg1: i32) -> (i32, i32) {
    %c1_i32 = arith.constant 1 : i32
    %0 = arith.muli %arg0, %c1_i32 : i32
    %1 = arith.addi %0, %arg1 : i32
    %c0_i32 = arith.constant 0 : i32
    %c0_i32_0 = arith.constant 0 : i32
    return %1, %c0_i32 : i32, i32
  }
  func.func @transform_1(%arg0: i32, %arg1: i32) -> (i32, i32) {
    %c1_i32 = arith.constant 1 : i32
    %0 = arith.muli %arg0, %c1_i32 : i32
    %1 = arith.addi %0, %arg1 : i32
    %c0_i32 = arith.constant 0 : i32
    %c0_i32_0 = arith.constant 0 : i32
    return %1, %c0_i32 : i32, i32
  }
  func.func @transform_2(%arg0: i32, %arg1: i32) -> (i32, i32, i32) {
    %c0_i32 = arith.constant 0 : i32
    %c0_i32_0 = arith.constant 0 : i32
    %c0_i32_1 = arith.constant 0 : i32
    return %arg0, %c0_i32, %c0_i32_0 : i32, i32, i32
  }
  func.func @transform_3(%arg0: i32, %arg1: i32) -> (i32, i32, i32) {
    %c0_i32 = arith.constant 0 : i32
    %c0_i32_0 = arith.constant 0 : i32
    %c0_i32_1 = arith.constant 0 : i32
    return %arg0, %c0_i32, %c0_i32_0 : i32, i32, i32
  }
  func.func @transform_4(%arg0: i32, %arg1: i32) -> (i32, i32, i32) {
    %c0_i32 = arith.constant 0 : i32
    %c0_i32_0 = arith.constant 0 : i32
    %c0_i32_1 = arith.constant 0 : i32
    return %arg0, %c0_i32, %c0_i32_0 : i32, i32, i32
  }
}

</mosaic_0001>

<bundles_post_ra>
// kernel: tpu_custom_call.1
= control target key start
LH: loop header
LB: loop body
LE: loop exit
PB: predicated region body
PF: predicated region fallthrough
CT: control target
= control target key end

     0   :  { %10 = vsyncpa [#allocation3], 0  ;;  %s339_s0 = inlined_call_operand.hbm [shape: f32[16,128], index: 0, kind: input, shape index: {}]   ;;  %s340_s1 = inlined_call_operand.hbm [shape: f32[16,128], index: 1, kind: input, shape index: {}]   ;;  %s341_s2 = inlined_call_operand.hbm [shape: f32[1,8,128], index: 2, kind: output, shape index: {0}]   ;;  %s342_s3 = inlined_call_operand.hbm [shape: f32[1,8,128], index: 3, kind: output, shape index: {1}]   ;;  %s343_s4 = inlined_call_operand.hbm [shape: f32[1,8,128], index: 4, kind: output, shape index: {2}]  }
   0x1   :  { %11 = vsyncpa [#allocation6], 0 }
   0x2   :  { %12 = vsyncpa [#allocation4], 0 }
   0x3   :  { %13 = vsyncpa [#allocation9], 0  ;;  %s280_s15 = smov [#allocation2]  }
   0x4   :  { %s23_s16 = sshll.u32 %s280_s15, 4  ;;  %s24_s16 = int_to_ptr.vmem [resolvable:$true] %s23_s16 }
   0x5   :  { %s180_s17 = scalar_lea.vmem %s24_s16, 256  ;;  %p185_p1 = scmp.lt.s32.totalorder %s24_s16, %s24_s16 }
   0x6   :  { %p181_p0 = scmp.ne.s32.totalorder %s24_s16, %s180_s17  ;;  %p186_p2 = scmp.lt.s32.totalorder %s180_s17, %s180_s17 }
   0x8   :  { %p187_p3 = por %p186_p2, %p185_p1 }
   0xa   :  { %p188_p4 = pnand %p187_p3, %p181_p0 }
   0xc   :  { %191 = shalt.err (!%p188_p4)
}
   0xd   :  { %s281_s18 = smov 128   ;;  %s282_s19 = smov 8  }
   0xe   :  { %29 = dma.hbm_to_vmem [thread:$0]  %s339_s0, 256, %s24_s16, [#allocation3], %s281_s18, %s281_s18, %s282_s19  }
   0xf   :  { %s283_s22 = smov [#allocation5]  }
  0x10   :  { %s39_s23 = sshll.u32 %s283_s22, 4  ;;  %s40_s23 = int_to_ptr.vmem [resolvable:$true] %s39_s23 }
  0x11   :  { %s200_s24 = scalar_lea.vmem %s40_s23, 256  ;;  %p205_p6 = scmp.lt.s32.totalorder %s40_s23, %s40_s23 }
  0x12   :  { %p201_p5 = scmp.ne.s32.totalorder %s40_s23, %s200_s24  ;;  %p206_p7 = scmp.lt.s32.totalorder %s200_s24, %s200_s24 }
  0x14   :  { %p207_p8 = por %p206_p7, %p205_p6 }
  0x16   :  { %p208_p9 = pnand %p207_p8, %p201_p5 }
  0x18   :  { %211 = shalt.err (!%p208_p9)
}
  0x19   :  { %45 = dma.hbm_to_vmem [thread:$0]  %s340_s1, 256, %s40_s23, [#allocation6], %s281_s18, %s281_s18, %s282_s19  }
  0x1a   :  { %272 = dma.done.wait [#allocation3], 256  }
  0x1b   :  { %273 = vsyncadd [#allocation3], 4294967040 }
  0x1c   :  { %274 = dma.done.wait [#allocation6], 256  }
  0x1d   :  { %275 = vsyncadd [#allocation6], 4294967040  ;;  %v318_v0 = vld [vmem:[#allocation2] sm:$0xff]  ;;  %v320_v1 = vld [vmem:[#allocation2 + $0x8] sm:$0xff]  ;;  %s284_s0 = smov [#allocation8]   ;;  %s285_s27 = smov [#allocation7]  }
  0x1e   :  { %v65_v2 = vld [vmem:[#allocation5] sm:$0xff]  ;;  %v66_v3 = vld [vmem:[#allocation5 + $0x8] sm:$0xff]  ;;  %v82_v5 = vand.u32 2147483647, %v318_v0  ;;  %v83_v6 = vand.u32 2147483647, %v320_v1 }
  0x1f   :  { %v74_v4 = vadd.f32 %v65_v2, %v318_v0  ;;  %v68_v7 = vmul.f32 %v65_v2, %v318_v0  ;;  %v75_v8 = vadd.f32 %v66_v3, %v320_v1  ;;  %v69_v9 = vmul.f32 %v66_v3, %v320_v1  ;;  %s129_s1 = sshll.u32 %s284_s0, 4  ;;  %s119_s28 = sshll.u32 %s285_s27, 4  ;;  %s130_s1 = int_to_ptr.vmem [resolvable:$true] %s129_s1  ;;  %s120_s28 = int_to_ptr.vmem [resolvable:$true] %s119_s28 }
  0x20   :  { %v84_v10 = vsub.f32 0.0, %v82_v5  ;;  %v85_v11 = vsub.f32 0.0, %v83_v6  ;;  %s212_s29 = scalar_lea.vmem %s130_s1, 128  ;;  %p217_p11 = scmp.lt.s32.totalorder %s130_s1, %s130_s1 }
  0x21   :  { %v76_v12 = vadd.f32 %v75_v8, %v74_v4  ;;  %v70_v13 = vadd.f32 %v69_v9, %v68_v7  ;;  %p213_p10 = scmp.ne.s32.totalorder %s130_s1, %s212_s29  ;;  %p218_p12 = scmp.lt.s32.totalorder %s212_s29, %s212_s29 }
  0x22   :  { %v86_v14 = vmul.f32 1.442695, %v84_v10  ;;  %v88_v15 = vmul.f32 1.442695, %v85_v11 }
  0x23   :  { %78 = vst [vmem:[#allocation8] sm:$0xff] %v76_v12  ;;  %72 = vst [vmem:[#allocation7] sm:$0xff] %v70_v13  ;;  %p219_p13 = por %p218_p12, %p217_p11 }
  0x24   :  { %164 = vpow2.f32 %v86_v14 }
  0x25   :  { %166 = vpow2.f32 %v88_v15  ;;  %p220_p0 = pnand %p219_p13, %p213_p10 }
  0x27   :  { %223 = shalt.err (!%p220_p0)
}
  0x28   :  { %132 = dma.vmem_to_hbm [thread:$0]  %s130_s1, 128, %s342_s3, [#allocation9]  }
  0x29   :  { %s232_s6 = scalar_lea.vmem %s120_s28, 128  ;;  %p237_p2 = scmp.lt.s32.totalorder %s120_s28, %s120_s28 }
  0x2a   :  { %p233_p1 = scmp.ne.s32.totalorder %s120_s28, %s232_s6  ;;  %p238_p3 = scmp.lt.s32.totalorder %s232_s6, %s232_s6 }
  0x2c   :  { %p239_p4 = por %p238_p3, %p237_p2 }
  0x2e   :  { %p240_p5 = pnand %p239_p4, %p233_p1 }
  0x30   :  { %243 = shalt.err (!%p240_p5)
}
  0x31   :  { %122 = dma.vmem_to_hbm [thread:$0]  %s120_s28, 128, %s341_s2, [#allocation4]   ;;  %v165_v16 = vpop.eup %164  ;;  %v80_v28 = vmax.f32 %v318_v0, 0.0  ;;  %v81_v31 = vmax.f32 %v320_v1, 0.0 }
  0x32   :  { %v167_v17 = vpop.eup %166  ;;  %v90_v18 = vadd.f32 1.0, %v165_v16  ;;  %v93_v20 = vmul.f32 -0.5, %v165_v16  ;;  %v96_v23 = vand.u32 2147483647, %v165_v16  ;;  %s286_s2 = smov [#allocation10]  }
  0x33   :  { %v99_v19 = vadd.f32 1.0, %v167_v17  ;;  %v102_v21 = vmul.f32 -0.5, %v167_v17  ;;  %v105_v25 = vand.u32 2147483647, %v167_v17  ;;  %s139_s3 = sshll.u32 %s286_s2, 4  ;;  %s140_s3 = int_to_ptr.vmem [resolvable:$true] %s139_s3 }
  0x34   :  { %168 = vlog2.f32 %v90_v18  ;;  %v94_v22 = vadd.f32 1.0, %v93_v20  ;;  %vm97_vm0 = vcmp.lt.f32.partialorder %v96_v23, 0.0004427343  ;;  %s252_s9 = scalar_lea.vmem %s140_s3, 128  ;;  %p257_p7 = scmp.lt.s32.totalorder %s140_s3, %s140_s3 }
  0x35   :  { %170 = vlog2.f32 %v99_v19  ;;  %v103_v24 = vadd.f32 1.0, %v102_v21  ;;  %vm106_vm1 = vcmp.lt.f32.partialorder %v105_v25, 0.0004427343  ;;  %p253_p6 = scmp.ne.s32.totalorder %s140_s3, %s252_s9  ;;  %p258_p8 = scmp.lt.s32.totalorder %s252_s9, %s252_s9 }
  0x36   :  { %v95_v26 = vmul.f32 %v165_v16, %v94_v22 }
  0x37   :  { %v104_v29 = vmul.f32 %v167_v17, %v103_v24  ;;  %p259_p9 = por %p258_p8, %p257_p7 }
  0x39   :  { %p260_p10 = pnand %p259_p9, %p253_p6 }
  0x41   :  { %v169_v27 = vpop.eup %168 }
  0x42   :  { %v171_v30 = vpop.eup %170  ;;  %v92_v32 = vmul.f32 0.6931472, %v169_v27 }
  0x43   :  { %v101_v33 = vmul.f32 0.6931472, %v171_v30 }
  0x44   :  { %v98_v34 = vsel %vm97_vm0, %v95_v26, %v92_v32 }
  0x45   :  { %v107_v35 = vsel %vm106_vm1, %v104_v29, %v101_v33  ;;  %v108_v36 = vadd.f32 %v98_v34, %v80_v28 }
  0x46   :  { %v109_v37 = vadd.f32 %v107_v35, %v81_v31 }
  0x48   :  { %v110_v38 = vadd.f32 %v109_v37, %v108_v36 }
  0x4a   :  { %112 = vst [vmem:[#allocation10] sm:$0xff] %v110_v38 }
  0x4b   :  { %263 = shalt.err (!%p260_p10)
}
  0x4c   :  { %142 = dma.vmem_to_hbm [thread:$0]  %s140_s3, 128, %s343_s4, [#allocation9]  }
  0x4d   :  { %276 = dma.done.wait [#allocation4], 128  }
  0x4e   :  { %277 = vsyncadd [#allocation4], 4294967168 }
  0x4f   :  { %278 = dma.done.wait [#allocation9], 256  }
  0x50   :  { %279 = vsyncadd [#allocation9], 4294967040 }
  0x51   :  { %152 = vsyncpa [#allocation3], 1 }
  0x52   :  { %153 = vsyncpa [#allocation6], 1 }
  0x53   :  { %154 = vsyncpa [#allocation4], 1 }
  0x54   :  { %155 = vsyncpa [#allocation9], 1 }

</bundles_post_ra>
